<compile_context>
chip_gen: v5e
topology: v5e:2x2
jax: 0.10.0
libtpu: 0.0.40
codegen_flags: <defaults>
</compile_context>

<pallas_src>
import jax
import jax.numpy as jnp
from jax import lax
from jax.experimental import pallas as pl
from jax.experimental.pallas import tpu as pltpu


def classifier_kernel(x_ref, w1_ref, w2_ref, b1_ref, b2_ref, o_ref):
    # x: [TB, D]; w1, w2: [C, D] (PyTorch Linear layout); b1, b2: [1, C]
    # Branch fusion on the VPU (free under MXU/DMA slack).
    w = (w1_ref[...] + w2_ref[...]) * 0.5            # [C, D]
    b = (b1_ref[...] + b2_ref[...]) * 0.5            # [1, C]
    # x @ w.T without any wrapper transpose: contract x dim 1 with w dim 1.
    acc = lax.dot_general(
        x_ref[...], w,
        dimension_numbers=(((1,), (1,)), ((), ())),
        preferred_element_type=jnp.float32,
    )                                                # [TB, C] f32
    o_ref[...] = (acc + b).astype(o_ref.dtype)


def classifier_forward(x, w1, b1, w2, b2, *, tile_b=512):
    """Classfier forward (distillation=True, eval mode).

    x      : [B, D]   float32 input features
    w1, w2 : [C, D]   PyTorch Linear weights ([out_features, in_features])
    b1, b2 : [C]      PyTorch Linear biases
    returns: [B, C]   averaged classifier / distillation-classifier logits
    """
    B, D = x.shape
    C = w1.shape[0]

    # 2-D views of the biases (metadata-only reshape, fuses away in XLA).
    b1r = b1.reshape(1, C)
    b2r = b2.reshape(1, C)

    itemsize = jnp.dtype(x.dtype).itemsize
    cost = pl.CostEstimate(
        flops=2 * B * D * C + 2 * C * D + B * C,
        transcendentals=0,
        bytes_accessed=(B * D + 2 * C * D + 2 * C + B * C) * itemsize,
    )

    if B <= tile_b:
        # Grid-less path: whole working set (<~1 MiB at these sizes) resident
        # in VMEM, single MXU matmul, no per-step overhead.
        return pl.pallas_call(
            classifier_kernel,
            out_shape=jax.ShapeDtypeStruct((B, C), x.dtype),
            in_specs=[
                pl.BlockSpec(memory_space=pltpu.MemorySpace.VMEM),  # x
                pl.BlockSpec(memory_space=pltpu.MemorySpace.VMEM),  # w1
                pl.BlockSpec(memory_space=pltpu.MemorySpace.VMEM),  # w2
                pl.BlockSpec(memory_space=pltpu.MemorySpace.VMEM),  # b1
                pl.BlockSpec(memory_space=pltpu.MemorySpace.VMEM),  # b2
            ],
            out_specs=pl.BlockSpec(memory_space=pltpu.MemorySpace.VMEM),
            cost_estimate=cost,
        )(x, w1, w2, b1r, b2r)

    # B-tiled path for larger batches: weights/bias stay VMEM-resident
    # (index_map -> (0, 0)), batch axis sharded across TensorCores.
    assert tile_b % 8 == 0, "tile_b must be a multiple of 8 (sublane tiling)"
    grid = (pl.cdiv(B, tile_b),)
    return pl.pallas_call(
        classifier_kernel,
        out_shape=jax.ShapeDtypeStruct((B, C), x.dtype),
        grid_spec=pltpu.PrefetchScalarGridSpec(
            num_scalar_prefetch=0,
            grid=grid,
            in_specs=[
                pl.BlockSpec((tile_b, D), lambda i: (i, 0)),  # x tile
                pl.BlockSpec((C, D), lambda i: (0, 0)),       # w1 (resident)
                pl.BlockSpec((C, D), lambda i: (0, 0)),       # w2 (resident)
                pl.BlockSpec((1, C), lambda i: (0, 0)),       # b1 (resident)
                pl.BlockSpec((1, C), lambda i: (0, 0)),       # b2 (resident)
            ],
            out_specs=pl.BlockSpec((tile_b, C), lambda i: (i, 0)),
        ),
        compiler_params=pltpu.CompilerParams(
            dimension_semantics=("parallel",)),
        cost_estimate=cost,
    )(x, w1, w2, b1r, b2r)


if __name__ == "__main__":
    # Classfier(dim=128, num_classes=128, distillation=True); batch of 8.
    B, D, C = 8, 128, 128

    key = jax.random.PRNGKey(0)
    kx, kw1, kb1, kw2, kb2, kx2 = jax.random.split(key, 6)

    x = jax.random.normal(kx, (B, D), dtype=jnp.float32)

    # Linear weights: trunc_normal_(std=0.02) approximated with scaled normals
    # (exact init values are irrelevant for a forward-pass check).  Biases are
    # made nonzero (module inits them to 0) so the bias path is exercised.
    w1 = 0.02 * jax.random.normal(kw1, (C, D), dtype=jnp.float32)
    w2 = 0.02 * jax.random.normal(kw2, (C, D), dtype=jnp.float32)
    b1 = 0.01 * jax.random.normal(kb1, (C,), dtype=jnp.float32)
    b2 = 0.01 * jax.random.normal(kb2, (C,), dtype=jnp.float32)

    # Pure-JAX reference: the unfused two-branch forward.
    def ref_fwd(xx):
        return ((xx @ w1.T + b1) + (xx @ w2.T + b2)) * 0.5

    # 1) small-batch, grid-less path
    out = classifier_forward(x, w1, b1, w2, b2)
    jax.block_until_ready(out)
    assert out.shape == (B, C)
    assert jnp.allclose(out, ref_fwd(x), atol=1e-5, rtol=1e-5)

    # 2) B-tiled, "parallel" path (force it with a small tile)
    B2 = 256
    x2 = jax.random.normal(kx2, (B2, D), dtype=jnp.float32)
    out2 = classifier_forward(x2, w1, b1, w2, b2, tile_b=128)
    jax.block_until_ready(out2)
    assert out2.shape == (B2, C)
    assert jnp.allclose(out2, ref_fwd(x2), atol=1e-5, rtol=1e-5)

    print("KERNEL_OK")
</pallas_src>

<mosaic_0001>
module attributes {stable_mosaic.version = 11 : i64} {
  func.func @classifier_kernel(%arg0: memref<8x128xf32, #tpu.memory_space<vmem>>, %arg1: memref<128x128xf32, #tpu.memory_space<vmem>>, %arg2: memref<128x128xf32, #tpu.memory_space<vmem>>, %arg3: memref<1x128xf32, #tpu.memory_space<vmem>>, %arg4: memref<1x128xf32, #tpu.memory_space<vmem>>, %arg5: memref<8x128xf32, #tpu.memory_space<vmem>>) attributes {dimension_semantics = [], scalar_prefetch = 0 : i64, scratch_operands = 0 : i64, tpu.core_type = #tpu.core_type<tc>} {
    %c0 = arith.constant 0 : index
    %c0_0 = arith.constant 0 : index
    %0 = vector.load %arg1[%c0, %c0_0] : memref<128x128xf32, #tpu.memory_space<vmem>>, vector<128x128xf32>
    %c0_1 = arith.constant 0 : index
    %c0_2 = arith.constant 0 : index
    %1 = vector.load %arg2[%c0_1, %c0_2] : memref<128x128xf32, #tpu.memory_space<vmem>>, vector<128x128xf32>
    %2 = arith.addf %0, %1 : vector<128x128xf32>
    %cst = arith.constant 5.000000e-01 : f32
    %3 = vector.broadcast %cst : f32 to vector<128x128xf32>
    %4 = arith.mulf %2, %3 : vector<128x128xf32>
    %c0_3 = arith.constant 0 : index
    %c0_4 = arith.constant 0 : index
    %5 = vector.load %arg3[%c0_3, %c0_4] : memref<1x128xf32, #tpu.memory_space<vmem>>, vector<1x128xf32>
    %c0_5 = arith.constant 0 : index
    %c0_6 = arith.constant 0 : index
    %6 = vector.load %arg4[%c0_5, %c0_6] : memref<1x128xf32, #tpu.memory_space<vmem>>, vector<1x128xf32>
    %7 = arith.addf %5, %6 : vector<1x128xf32>
    %cst_7 = arith.constant 5.000000e-01 : f32
    %8 = vector.broadcast %cst_7 : f32 to vector<1x128xf32>
    %9 = arith.mulf %7, %8 : vector<1x128xf32>
    %c0_8 = arith.constant 0 : index
    %c0_9 = arith.constant 0 : index
    %10 = vector.load %arg0[%c0_8, %c0_9] : memref<8x128xf32, #tpu.memory_space<vmem>>, vector<8x128xf32>
    %cst_10 = arith.constant dense<0.000000e+00> : vector<8x128xf32>
    %11 = tpu.matmul %10, %4, %cst_10 {dimension_numbers = #tpu.dot_dimension_numbers<[1], [1], [0], [0], [0, 0, 1, 0], [], []>} : vector<8x128xf32>, vector<128x128xf32>, vector<8x128xf32> -> vector<8x128xf32>
    %12 = vector.broadcast %9 : vector<1x128xf32> to vector<8x128xf32>
    %13 = arith.addf %11, %12 : vector<8x128xf32>
    %c0_11 = arith.constant 0 : index
    %c0_12 = arith.constant 0 : index
    %14 = vector.load %arg5[%c0_11, %c0_12] : memref<8x128xf32, #tpu.memory_space<vmem>>, vector<8x128xf32>
    tpu.vector_store %arg5[%c0_11, %c0_12], %13 {strides = array<i32>} : memref<8x128xf32, #tpu.memory_space<vmem>>, vector<8x128xf32>,
    return
  }
}

</mosaic_0001>

<bundles_post_ra>
// kernel: tpu_custom_call.1
= control target key start
LH: loop header
LB: loop body
LE: loop exit
PB: predicated region body
PF: predicated region fallthrough
CT: control target
= control target key end

     0   :  { %10 = vsyncpa [#allocation3], 0  ;;  %s339_s0 = inlined_call_operand.hbm [shape: f32[8,128], index: 0, kind: input, shape index: {}]   ;;  %s340_s1 = inlined_call_operand.hbm [shape: f32[128,128], index: 1, kind: input, shape index: {}]   ;;  %s341_s2 = inlined_call_operand.hbm [shape: f32[128,128], index: 2, kind: input, shape index: {}]   ;;  %s342_s3 = inlined_call_operand.vmem [shape: f32[1,128], index: 3, kind: input, shape index: {}]   ;;  %s343_s4 = inlined_call_operand.vmem [shape: f32[1,128], index: 4, kind: input, shape index: {}]   ;;  %s344_s5 = inlined_call_operand.hbm [shape: f32[8,128], index: 5, kind: output, shape index: {}]  }
   0x1   :  { %11 = vsyncpa [#allocation6], 0  ;;  %s28_s20 = sshll.u32 %s340_s1, 4  ;;  %s29_s20 = int_to_ptr.hbm [resolvable:$true] %s28_s20 }
   0x2   :  { %12 = vsyncpa [#allocation4], 0  ;;  %s285_s21 = smov [#allocation5]   ;;  %s18_s25 = sshll.u32 %s339_s0, 4  ;;  %s19_s25 = int_to_ptr.hbm [resolvable:$true] %s18_s25 }
   0x3   :  { %s30_s22 = sshll.u32 %s285_s21, 4  ;;  %s286_s26 = smov 128   ;;  %s31_s22 = int_to_ptr.vmem [resolvable:$true] %s30_s22 }
   0x4   :  { %s287_s27 = smov 8   ;;  %s288_s28 = smov [#allocation2]  }
   0x5   :  { %36 = dma.hbm_to_vmem [thread:$0]  %s29_s20, 2048, %s31_s22, [#allocation6], %s286_s26, %s286_s26, %s287_s27  }
   0x6   :  { %s20_s29 = sshll.u32 %s288_s28, 4  ;;  %s41_s7 = sshll.u32 %s341_s2, 4  ;;  %s21_s29 = int_to_ptr.vmem [resolvable:$true] %s20_s29  ;;  %s42_s7 = int_to_ptr.hbm [resolvable:$true] %s41_s7 }
   0x7   :  { %23 = dma.hbm_to_vmem [thread:$0]  %s19_s25, 128, %s21_s29, [#allocation3]  }
   0x8   :  { %s289_s1 = smov [#allocation7]  }
   0x9   :  { %s43_s8 = sshll.u32 %s289_s1, 4  ;;  %s44_s8 = int_to_ptr.vmem [resolvable:$true] %s43_s8 }
   0xa   :  { %49 = dma.hbm_to_vmem [thread:$0]  %s42_s7, 2048, %s44_s8, [#allocation6], %s286_s26, %s286_s26, %s287_s27  }
   0xb   :  { %279 = dma.done.wait [#allocation3], 128  }
   0xc   :  { %280 = vsyncadd [#allocation3], 4294967168 }
   0xd   :  { %281 = dma.done.wait [#allocation6], 4096  }
   0xe   :  { %282 = vsyncadd [#allocation6], 4294963200  ;;  %v81_v0 = vld [vmem:[#allocation5 + $0x78] sm:$0xff]  ;;  %v80_v2 = vld [vmem:[#allocation5 + $0x70] sm:$0xff]  ;;  %s290_s11 = smov [#allocation8]   ;;  %s166_s15 = sshll.u32 %s344_s5, 4  ;;  %s167_s15 = int_to_ptr.hbm [resolvable:$true] %s166_s15 }
   0xf   :  { %v97_v1 = vld [vmem:[#allocation7 + $0x78] sm:$0xff]  ;;  %v96_v4 = vld [vmem:[#allocation7 + $0x70] sm:$0xff]  ;;  %v79_v6 = vld [vmem:[#allocation5 + $0x68] sm:$0xff]  ;;  %s164_s12 = sshll.u32 %s290_s11, 4  ;;  %s165_s12 = int_to_ptr.vmem [resolvable:$true] %s164_s12 }
  0x10   :  { %v113_v3 = vadd.f32 %v97_v1, %v81_v0  ;;  %v112_v5 = vadd.f32 %v96_v4, %v80_v2  ;;  %v95_v7 = vld [vmem:[#allocation7 + $0x68] sm:$0xff]  ;;  %v78_v11 = vld [vmem:[#allocation5 + $0x60] sm:$0xff]  ;;  %v77_v15 = vld [vmem:[#allocation5 + $0x58] sm:$0xff] }
  0x11   :  { %v111_v10 = vadd.f32 %v95_v7, %v79_v6  ;;  %v94_v12 = vld [vmem:[#allocation7 + $0x60] sm:$0xff]  ;;  %v93_v16 = vld [vmem:[#allocation7 + $0x58] sm:$0xff]  ;;  %v76_v19 = vld [vmem:[#allocation5 + $0x50] sm:$0xff] }
  0x12   :  { %v129_v8 = vmul.f32 0.5, %v113_v3  ;;  %v128_v9 = vmul.f32 0.5, %v112_v5  ;;  %v110_v14 = vadd.f32 %v94_v12, %v78_v11  ;;  %v109_v18 = vadd.f32 %v93_v16, %v77_v15  ;;  %v92_v20 = vld [vmem:[#allocation7 + $0x50] sm:$0xff]  ;;  %v75_v23 = vld [vmem:[#allocation5 + $0x48] sm:$0xff]  ;;  %v74_v27 = vld [vmem:[#allocation5 + $0x40] sm:$0xff] }
  0x13   :  { %v127_v13 = vmul.f32 0.5, %v111_v10  ;;  %v108_v22 = vadd.f32 %v92_v20, %v76_v19  ;;  %v91_v24 = vld [vmem:[#allocation7 + $0x48] sm:$0xff]  ;;  %v90_v28 = vld [vmem:[#allocation7 + $0x40] sm:$0xff]  ;;  %v73_v31 = vld [vmem:[#allocation5 + $0x38] sm:$0xff] }
  0x14   :  { %138 = vmatpush.xpose.msra.mxu0 %v129_v8  ;;  %v126_v17 = vmul.f32 0.5, %v110_v14  ;;  %v125_v21 = vmul.f32 0.5, %v109_v18  ;;  %v107_v26 = vadd.f32 %v91_v24, %v75_v23  ;;  %v106_v30 = vadd.f32 %v90_v28, %v74_v27  ;;  %v89_v32 = vld [vmem:[#allocation7 + $0x38] sm:$0xff]  ;;  %v72_v35 = vld [vmem:[#allocation5 + $0x30] sm:$0xff]  ;;  %v71_v39 = vld [vmem:[#allocation5 + $0x28] sm:$0xff] }
  0x15   :  { %v124_v25 = vmul.f32 0.5, %v108_v22  ;;  %v105_v34 = vadd.f32 %v89_v32, %v73_v31  ;;  %v88_v36 = vld [vmem:[#allocation7 + $0x30] sm:$0xff]  ;;  %v87_v40 = vld [vmem:[#allocation7 + $0x28] sm:$0xff]  ;;  %v70_v43 = vld [vmem:[#allocation5 + $0x20] sm:$0xff] }
  0x16   :  { %v123_v29 = vmul.f32 0.5, %v107_v26  ;;  %v122_v33 = vmul.f32 0.5, %v106_v30  ;;  %v104_v38 = vadd.f32 %v88_v36, %v72_v35  ;;  %v103_v42 = vadd.f32 %v87_v40, %v71_v39  ;;  %v86_v44 = vld [vmem:[#allocation7 + $0x20] sm:$0xff]  ;;  %v69_v47 = vld [vmem:[#allocation5 + $0x18] sm:$0xff]  ;;  %v68_v51 = vld [vmem:[#allocation5 + $0x10] sm:$0xff] }
  0x17   :  { %v121_v37 = vmul.f32 0.5, %v105_v34  ;;  %v102_v46 = vadd.f32 %v86_v44, %v70_v43  ;;  %v85_v48 = vld [vmem:[#allocation7 + $0x18] sm:$0xff]  ;;  %v84_v52 = vld [vmem:[#allocation7 + $0x10] sm:$0xff]  ;;  %v67_v55 = vld [vmem:[#allocation5 + $0x8] sm:$0xff] }
  0x18   :  { %139 = vmatpush.xpose.msra.mxu0 %v128_v9  ;;  %v120_v41 = vmul.f32 0.5, %v104_v38  ;;  %v119_v45 = vmul.f32 0.5, %v103_v42  ;;  %v101_v50 = vadd.f32 %v85_v48, %v69_v47  ;;  %v100_v54 = vadd.f32 %v84_v52, %v68_v51  ;;  %v83_v56 = vld [vmem:[#allocation7 + $0x8] sm:$0xff]  ;;  %v66_v59 = vld [vmem:[#allocation5] sm:$0xff]  ;;  %v134_v0 = vld [vmem:[#allocation2] sm:$0xff] }
  0x19   :  { %v118_v49 = vmul.f32 0.5, %v102_v46  ;;  %v99_v58 = vadd.f32 %v83_v56, %v67_v55  ;;  %v82_v60 = vld [vmem:[#allocation7] sm:$0xff]  ;;  %v130_v1 = vld [vmem:[%s342_s3] sm:$0x1] }
  0x1a   :  { %v117_v53 = vmul.f32 0.5, %v101_v50  ;;  %v116_v57 = vmul.f32 0.5, %v100_v54  ;;  %v98_v62 = vadd.f32 %v82_v60, %v66_v59  ;;  %v131_v2 = vld [vmem:[%s343_s4] sm:$0x1] }
  0x1b   :  { %v115_v61 = vmul.f32 0.5, %v99_v58  ;;  %v132_v3 = vadd.f32 %v131_v2, %v130_v1 }
  0x1c   :  { %140 = vmatpush.xpose.msra.mxu0 %v127_v13  ;;  %v114_v63 = vmul.f32 0.5, %v98_v62 }
  0x1d   :  { %v133_v4 = vmul.f32 0.5, %v132_v3 }
  0x1f   :  { %v136_v5 = vperm.slane %v133_v4, 0 }
  0x20   :  { %141 = vmatpush.xpose.msra.mxu0 %v126_v17 }
  0x24   :  { %142 = vmatpush.xpose.msra.mxu0 %v125_v21 }
  0x28   :  { %143 = vmatpush.xpose.msra.mxu0 %v124_v25 }
  0x2c   :  { %144 = vmatpush.xpose.msra.mxu0 %v123_v29 }
  0x30   :  { %145 = vmatpush.xpose.msra.mxu0 %v122_v33 }
  0x34   :  { %146 = vmatpush.xpose.msra.mxu0 %v121_v37 }
  0x38   :  { %147 = vmatpush.xpose.msra.mxu0 %v120_v41 }
  0x3c   :  { %148 = vmatpush.xpose.msra.mxu0 %v119_v45 }
  0x40   :  { %149 = vmatpush.xpose.msra.mxu0 %v118_v49 }
  0x44   :  { %150 = vmatpush.xpose.msra.mxu0 %v117_v53 }
  0x48   :  { %151 = vmatpush.xpose.msra.mxu0 %v116_v57 }
  0x4c   :  { %152 = vmatpush.xpose.msra.mxu0 %v115_v61 }
  0x50   :  { %153 = vmatpush.xpose.msra.mxu0 %v114_v63 }
  0x53   :  { %154 = vmatmul.f32.vlgmr.msra.gmra.mxu0 %v134_v0 }
  0xd0   :  { %v155_v6 = vpop.f32.mrf.mxu0 }
  0xd1   :  { %v156_v7 = vadd.f32 %v155_v6, %v136_v5 }
  0xd3   :  { %158 = vst [vmem:[#allocation8] sm:$0xff] %v156_v7 }
  0xd4   :  { %169 = dma.vmem_to_hbm [thread:$0]  %s165_s12, 128, %s167_s15, [#allocation4]  }
  0xd5   :  { %283 = dma.done.wait [#allocation4], 128  }
  0xd6   :  { %284 = vsyncadd [#allocation4], 4294967168 }
  0xd7   :  { %174 = vsyncpa [#allocation3], 1 }
  0xd8   :  { %175 = vsyncpa [#allocation6], 1 }
  0xd9   :  { %176 = vsyncpa [#allocation4], 1 }

</bundles_post_ra>
